<compile_context>
chip_gen: v6e
topology: v6e:2x2x1
jax: 0.10.0
libtpu: 0.0.40
codegen_flags: <defaults>
</compile_context>

<pallas_src>
import math

import jax
import jax.numpy as jnp
from jax.experimental import pallas as pl
from jax.experimental.pallas import tpu as pltpu

GATE_K = 1  # synthetic top-1 gate


# ----------------------------------------------------------------------------
# helpers
# ----------------------------------------------------------------------------
def _pick_tile(dim, target, align):
    """Largest tile <= target that divides dim and is a multiple of align."""
    if dim <= target:
        return dim
    t = (target // align) * align
    while t > align and dim % t != 0:
        t -= align
    return t if (t >= align and dim % t == 0) else dim


# ----------------------------------------------------------------------------
# Pallas kernel 1: per-expert FFN, H-tiled, bf16 MXU tiles, f32 accumulator,
# combine-weight applied in the epilogue.  Empty capacity tiles skip compute.
#   weighted_eo[e, c] = slot_w[e, c] * (relu(x[e, c] @ W1_e) @ W2_e)
# ----------------------------------------------------------------------------
def _expert_ffn_kernel(cnt_ref, x_ref, w1_ref, w2_ref, sw_ref, o_ref, acc_ref):
    e = pl.program_id(0)
    c = pl.program_id(1)
    h = pl.program_id(2)
    tc = x_ref.shape[0]

    @pl.when(h == 0)
    def _init():
        acc_ref[...] = jnp.zeros_like(acc_ref)

    # Skip the matmuls if this whole capacity tile holds only padded slots.
    @pl.when(c * tc < cnt_ref[e])
    def _compute():
        hblk = jnp.dot(x_ref[...], w1_ref[...],
                       preferred_element_type=jnp.float32)       # (tc, th) f32
        hblk = jnp.maximum(hblk, 0.0).astype(x_ref.dtype)        # relu, bf16
        acc_ref[...] = acc_ref[...] + jnp.dot(
            hblk, w2_ref[...], preferred_element_type=jnp.float32)

    @pl.when(h == pl.num_programs(2) - 1)
    def _finalize():
        # fuse the per-slot combine weight (0 for empty/dropped slots)
        o_ref[...] = (acc_ref[...] * sw_ref[...]).astype(o_ref.dtype)


def expert_ffn(dispatched, w1, w2, slot_w3, counts, *, tc, th):
    """dispatched (E,C,M) bf16, w1 (E,M,H) bf16, w2 (E,H,M) bf16,
    slot_w3 (E,C,1) f32, counts (E,) i32  ->  weighted expert out (E,C,M) bf16."""
    E, C, M = dispatched.shape
    H = w1.shape[-1]
    assert C % tc == 0 and H % th == 0 and M % 128 == 0

    # double-buffered per-step tiles + accumulator + headroom
    per_step = tc * M * 2 + M * th * 2 + th * M * 2 + tc * 4 + tc * M * 2
    vmem_bytes = int(min(max(2 * per_step + tc * M * 4 + (4 << 20), 16 << 20),
                         32 << 20))

    return pl.pallas_call(
        _expert_ffn_kernel,
        out_shape=jax.ShapeDtypeStruct((E, C, M), jnp.bfloat16),
        grid_spec=pltpu.PrefetchScalarGridSpec(
            num_scalar_prefetch=1,
            grid=(E, C // tc, H // th),
            in_specs=[
                pl.BlockSpec((None, tc, M), lambda e, c, h, cnt: (e, c, 0)),
                pl.BlockSpec((None, M, th), lambda e, c, h, cnt: (e, 0, h)),
                pl.BlockSpec((None, th, M), lambda e, c, h, cnt: (e, h, 0)),
                pl.BlockSpec((None, tc, 1), lambda e, c, h, cnt: (e, c, 0)),
            ],
            out_specs=pl.BlockSpec((None, tc, M), lambda e, c, h, cnt: (e, c, 0)),
            scratch_shapes=[pltpu.VMEM((tc, M), jnp.float32)],
        ),
        compiler_params=pltpu.CompilerParams(
            dimension_semantics=("parallel", "parallel", "arbitrary"),
            vmem_limit_bytes=vmem_bytes,
        ),
    )(counts, dispatched, w1, w2, slot_w3)


# ----------------------------------------------------------------------------
# Pallas kernel 2: combine = weighted row gather.
#   out[n] = valid[n] ? weighted_eo[slot_idx[n]] : 0
# slot_idx / valid are scalar-prefetched (SMEM); the expert-output row is
# gathered via a data-dependent pl.Element row BlockSpec.  Output is written as
# lane-dense (tb, M) blocks kept resident across the inner row axis.
# ----------------------------------------------------------------------------
def _combine_kernel(slot_ref, valid_ref, weo_ref, o_ref):
    t = pl.program_id(0)
    r = pl.program_id(1)
    n = t * pl.num_programs(1) + r
    v = (valid_ref[n] > 0).astype(jnp.float32)
    row = weo_ref[...].astype(jnp.float32) * v          # (1, M)
    o_ref[pl.ds(r, 1), :] = row.astype(o_ref.dtype)


def combine(slot_idx, valid, weo_flat, *, tb):
    """slot_idx (N,) i32 (clamped >= 0), valid (N,) i32, weo_flat (E*C, M) bf16
    -> (N, M) f32."""
    N = slot_idx.shape[0]
    _, M = weo_flat.shape
    assert N % tb == 0 and M % 128 == 0
    return pl.pallas_call(
        _combine_kernel,
        out_shape=jax.ShapeDtypeStruct((N, M), jnp.float32),
        grid_spec=pltpu.PrefetchScalarGridSpec(
            num_scalar_prefetch=2,
            grid=(N // tb, tb),
            in_specs=[
                pl.BlockSpec((pl.Element(1), M),
                             lambda t, r, slot, vld: (slot[t * tb + r], 0)),
            ],
            out_specs=pl.BlockSpec((tb, M), lambda t, r, slot, vld: (t, 0)),
        ),
        compiler_params=pltpu.CompilerParams(
            dimension_semantics=("parallel", "arbitrary")),
    )(slot_idx, valid, weo_flat)


# ----------------------------------------------------------------------------
# Synthetic top-1 gate (the injected `gate` module), fixed-capacity form.
# Produces slot->token map, per-slot combine weight, token->slot inverse map,
# and per-expert kept-token counts.
# ----------------------------------------------------------------------------
def top1_gate(x, wg, num_experts, capacity_factor):
    N, _ = x.shape
    capacity = int(math.ceil(N * capacity_factor / num_experts))

    logits = x @ wg                                      # (N, E) gate glue
    probs = jax.nn.softmax(logits, axis=-1)
    expert_idx = jnp.argmax(probs, axis=-1)              # (N,)
    gate_w = jnp.max(probs, axis=-1)                     # (N,)

    onehot = jax.nn.one_hot(expert_idx, num_experts, dtype=jnp.int32)
    pos_in_expert = jnp.sum((jnp.cumsum(onehot, axis=0) - 1) * onehot, axis=-1)
    keep = pos_in_expert < capacity

    token_ids = jnp.arange(N, dtype=jnp.int32)
    # slot -> token (empty slots keep token 0; their weight is 0 so it is inert)
    token_idx = jnp.zeros((num_experts, capacity), jnp.int32)
    token_idx = token_idx.at[expert_idx, pos_in_expert].set(token_ids, mode="drop")
    # per-slot combine weight
    slot_w = jnp.zeros((num_experts, capacity), jnp.float32)
    slot_w = slot_w.at[expert_idx, pos_in_expert].set(
        gate_w.astype(jnp.float32), mode="drop")
    # token -> flat slot (-1 for dropped tokens)
    flat_slot = expert_idx.astype(jnp.int32) * capacity + pos_in_expert.astype(jnp.int32)
    inv_slot = jnp.where(keep, flat_slot, -1).astype(jnp.int32)
    # per-expert kept-token counts
    counts = jnp.minimum(jnp.sum(onehot, axis=0), capacity).astype(jnp.int32)
    return token_idx, slot_w, inv_slot, counts, capacity


# ----------------------------------------------------------------------------
# MixtureOfExpertsES.forward (single device: expert_group_size == 1,
# fp16_mode=False, nonpadding=None)
# ----------------------------------------------------------------------------
def moe_es_forward(x_stm, wg, w1, w2, capacity_factor, *, tc=None, th=None, tb=None):
    assert x_stm.ndim == 3, "input Tensor must have dimensions: (s, t, m)"
    S, T, M = x_stm.shape
    reshaped_input = x_stm.reshape(-1, M)                 # (N, M)
    N = reshaped_input.shape[0]
    E, _, H = w1.shape

    token_idx, slot_w, inv_slot, counts, C = top1_gate(
        reshaped_input, wg, E, capacity_factor)

    tc = _pick_tile(C, 128, 16) if tc is None else tc
    th = _pick_tile(H, 512, 128) if th is None else th
    tb = _pick_tile(N, 256, 16) if tb is None else tb

    # dispatch gather at bf16 (halves the dispatched-intermediate HBM traffic)
    # TODO(synk): fuse this gather into the FFN kernel via manual per-row DMA.
    xb = reshaped_input.astype(jnp.bfloat16)
    dispatched = jnp.take(xb, token_idx.reshape(-1), axis=0).reshape(E, C, M)

    w1b = w1.astype(jnp.bfloat16)
    w2b = w2.astype(jnp.bfloat16)

    # expert compute (combine weight fused into the epilogue) — Pallas kernel
    weighted_eo = expert_ffn(dispatched, w1b, w2b, slot_w[..., None], counts,
                             tc=tc, th=th)               # (E, C, M) bf16

    # scatter-back + combine == weighted row gather — Pallas kernel
    slot_idx = jnp.maximum(inv_slot, 0).astype(jnp.int32)
    valid = (inv_slot >= 0).astype(jnp.int32)
    combined = combine(slot_idx, valid, weighted_eo.reshape(E * C, M), tb=tb)

    return combined.reshape(S, T, M).astype(x_stm.dtype)


# ----------------------------------------------------------------------------
# Pure-JAX reference mirroring the same numerics (bf16 matmul inputs, f32 acc)
# ----------------------------------------------------------------------------
def moe_es_reference(x_stm, wg, w1, w2, capacity_factor):
    S, T, M = x_stm.shape
    x = x_stm.reshape(-1, M)
    E = w1.shape[0]
    token_idx, slot_w, inv_slot, _, C = top1_gate(x, wg, E, capacity_factor)

    xb = x.astype(jnp.bfloat16)
    w1b = w1.astype(jnp.bfloat16)
    w2b = w2.astype(jnp.bfloat16)
    disp = jnp.take(xb, token_idx.reshape(-1), axis=0).reshape(E, C, M)
    h = jnp.einsum("ecm,emh->ech", disp, w1b, preferred_element_type=jnp.float32)
    h = jnp.maximum(h, 0.0).astype(jnp.bfloat16)
    eo = jnp.einsum("ech,ehm->ecm", h, w2b, preferred_element_type=jnp.float32)
    weo = (eo * slot_w[..., None]).astype(jnp.bfloat16).reshape(E * C, M)
    gathered = jnp.take(weo, jnp.maximum(inv_slot, 0), axis=0).astype(jnp.float32)
    out = gathered * (inv_slot >= 0).astype(jnp.float32)[:, None]
    return out.reshape(S, T, M).astype(x_stm.dtype)


if __name__ == "__main__":
    key = jax.random.PRNGKey(0)
    S, T, M = 2, 32, 128        # sequence, tokens, d_model -> N = 64 tokens
    E, H = 4, 256               # num experts, expert hidden dim
    capacity_factor = 2.0       # C = ceil(N * cf / E) = 32

    k1, k2, k3, k4 = jax.random.split(key, 4)
    x = jax.random.normal(k1, (S, T, M), dtype=jnp.float32)
    wg = jax.random.normal(k2, (M, E), dtype=jnp.float32) * 0.1      # gate weight
    w1 = jax.random.normal(k3, (E, M, H), dtype=jnp.float32) * 0.05  # expert linear1
    w2 = jax.random.normal(k4, (E, H, M), dtype=jnp.float32) * 0.05  # expert linear2

    # explicit tiles so all three grid axes / both kernels are exercised
    out = moe_es_forward(x, wg, w1, w2, capacity_factor, tc=16, th=128, tb=16)
    out = jax.block_until_ready(out)

    ref = moe_es_reference(x, wg, w1, w2, capacity_factor)
    assert out.shape == x.shape and out.dtype == x.dtype
    max_err = float(jnp.max(jnp.abs(out - ref)))
    assert jnp.allclose(out, ref, rtol=3e-2, atol=3e-2), max_err

    print("KERNEL_OK")
</pallas_src>

<mosaic_0001>
module attributes {stable_mosaic.version = 11 : i64} {
  func.func @_expert_ffn_kernel(%arg0: i32, %arg1: i32, %arg2: i32, %arg3: memref<4xi32, #tpu.memory_space<smem>>, %arg4: memref<1x16x128xbf16, #tpu.memory_space<vmem>>, %arg5: memref<1x128x128xbf16, #tpu.memory_space<vmem>>, %arg6: memref<1x128x128xbf16, #tpu.memory_space<vmem>>, %arg7: memref<1x16x1xf32, #tpu.memory_space<vmem>>, %arg8: memref<1x16x128xbf16, #tpu.memory_space<vmem>>, %arg9: memref<16x128xf32, #tpu.memory_space<vmem>>) attributes {dimension_semantics = [#tpu.dimension_semantics<parallel>, #tpu.dimension_semantics<parallel>, #tpu.dimension_semantics<arbitrary>], iteration_bounds = array<i64: 4, 2, 2>, scalar_prefetch = 1 : i64, scratch_operands = 1 : i64, tpu.core_type = #tpu.core_type<tc>, window_params = [{transform_indices = @transform_0, window_bounds = array<i64: 1, 16, 128>}, {transform_indices = @transform_1, window_bounds = array<i64: 1, 128, 128>}, {transform_indices = @transform_2, window_bounds = array<i64: 1, 128, 128>}, {transform_indices = @transform_3, window_bounds = array<i64: 1, 16, 1>}, {transform_indices = @transform_4, window_bounds = array<i64: 1, 16, 128>}]} {
    %c0_i32 = arith.constant 0 : i32
    %0 = arith.cmpi eq, %arg2, %c0_i32 : i32
    %1 = arith.extui %0 : i1 to i32
    %c0_i32_0 = arith.constant 0 : i32
    %2 = arith.cmpi ne, %1, %c0_i32_0 : i32
    scf.if %2 {
      %cst = arith.constant 0.000000e+00 : f32
      %12 = vector.broadcast %cst : f32 to vector<16x128xf32>
      %c0 = arith.constant 0 : index
      %c0_3 = arith.constant 0 : index
      %13 = vector.load %arg9[%c0, %c0_3] : memref<16x128xf32, #tpu.memory_space<vmem>>, vector<16x128xf32>
      tpu.vector_store %arg9[%c0, %c0_3], %12 {strides = array<i32>} : memref<16x128xf32, #tpu.memory_space<vmem>>, vector<16x128xf32>,
    } else {
    }
    %c16_i32 = arith.constant 16 : i32
    %3 = arith.muli %arg1, %c16_i32 : i32
    %4 = arith.index_cast %arg0 : i32 to index
    %5 = memref.load %arg3[%4] : memref<4xi32, #tpu.memory_space<smem>>
    %6 = arith.cmpi slt, %3, %5 : i32
    %7 = arith.extui %6 : i1 to i32
    %c0_i32_1 = arith.constant 0 : i32
    %8 = arith.cmpi ne, %7, %c0_i32_1 : i32
    scf.if %8 {
      %c0 = arith.constant 0 : index
      %c0_3 = arith.constant 0 : index
      %c0_4 = arith.constant 0 : index
      %12 = vector.load %arg4[%c0, %c0_3, %c0_4] : memref<1x16x128xbf16, #tpu.memory_space<vmem>>, vector<1x16x128xbf16>
      %13 = vector.shape_cast %12 : vector<1x16x128xbf16> to vector<16x128xbf16>
      %c0_5 = arith.constant 0 : index
      %c0_6 = arith.constant 0 : index
      %c0_7 = arith.constant 0 : index
      %14 = vector.load %arg5[%c0_5, %c0_6, %c0_7] : memref<1x128x128xbf16, #tpu.memory_space<vmem>>, vector<1x128x128xbf16>
      %15 = vector.shape_cast %14 : vector<1x128x128xbf16> to vector<128x128xbf16>
      %cst = arith.constant dense<0.000000e+00> : vector<16x128xf32>
      %16 = tpu.matmul %13, %15, %cst {dimension_numbers = #tpu.dot_dimension_numbers<[1], [0], [0], [1], [0, 0, 1, 1], [], []>} : vector<16x128xbf16>, vector<128x128xbf16>, vector<16x128xf32> -> vector<16x128xf32>
      %cst_8 = arith.constant 0.000000e+00 : f32
      %17 = vector.broadcast %cst_8 : f32 to vector<16x128xf32>
      %18 = arith.maximumf %16, %17 : vector<16x128xf32>
      %19 = arith.truncf %18 : vector<16x128xf32> to vector<16x128xbf16>
      %c0_9 = arith.constant 0 : index
      %c0_10 = arith.constant 0 : index
      %20 = vector.load %arg9[%c0_9, %c0_10] : memref<16x128xf32, #tpu.memory_space<vmem>>, vector<16x128xf32>
      %c0_11 = arith.constant 0 : index
      %c0_12 = arith.constant 0 : index
      %c0_13 = arith.constant 0 : index
      %21 = vector.load %arg6[%c0_11, %c0_12, %c0_13] : memref<1x128x128xbf16, #tpu.memory_space<vmem>>, vector<1x128x128xbf16>
      %22 = vector.shape_cast %21 : vector<1x128x128xbf16> to vector<128x128xbf16>
      %cst_14 = arith.constant dense<0.000000e+00> : vector<16x128xf32>
      %23 = tpu.matmul %19, %22, %cst_14 {dimension_numbers = #tpu.dot_dimension_numbers<[1], [0], [0], [1], [0, 0, 1, 1], [], []>} : vector<16x128xbf16>, vector<128x128xbf16>, vector<16x128xf32> -> vector<16x128xf32>
      %24 = arith.addf %20, %23 : vector<16x128xf32>
      %c0_15 = arith.constant 0 : index
      %c0_16 = arith.constant 0 : index
      %25 = vector.load %arg9[%c0_15, %c0_16] : memref<16x128xf32, #tpu.memory_space<vmem>>, vector<16x128xf32>
      tpu.vector_store %arg9[%c0_15, %c0_16], %24 {strides = array<i32>} : memref<16x128xf32, #tpu.memory_space<vmem>>, vector<16x128xf32>,
    } else {
    }
    %c1_i32 = arith.constant 1 : i32
    %9 = arith.cmpi eq, %arg2, %c1_i32 : i32
    %10 = arith.extui %9 : i1 to i32
    %c0_i32_2 = arith.constant 0 : i32
    %11 = arith.cmpi ne, %10, %c0_i32_2 : i32
    scf.if %11 {
      %c0 = arith.constant 0 : index
      %c0_3 = arith.constant 0 : index
      %12 = vector.load %arg9[%c0, %c0_3] : memref<16x128xf32, #tpu.memory_space<vmem>>, vector<16x128xf32>
      %c0_4 = arith.constant 0 : index
      %c0_5 = arith.constant 0 : index
      %c0_6 = arith.constant 0 : index
      %13 = vector.load %arg7[%c0_4, %c0_5, %c0_6] : memref<1x16x1xf32, #tpu.memory_space<vmem>>, vector<1x16x1xf32>
      %14 = vector.shape_cast %13 : vector<1x16x1xf32> to vector<16x1xf32>
      %15 = vector.broadcast %14 : vector<16x1xf32> to vector<16x128xf32>
      %16 = arith.mulf %12, %15 : vector<16x128xf32>
      %17 = arith.truncf %16 : vector<16x128xf32> to vector<16x128xbf16>
      %c0_7 = arith.constant 0 : index
      %c0_8 = arith.constant 0 : index
      %c0_9 = arith.constant 0 : index
      %18 = vector.load %arg8[%c0_7, %c0_8, %c0_9] : memref<1x16x128xbf16, #tpu.memory_space<vmem>>, vector<1x16x128xbf16>
      %19 = vector.shape_cast %18 : vector<1x16x128xbf16> to vector<16x128xbf16>
      %20 = vector.shape_cast %17 : vector<16x128xbf16> to vector<1x16x128xbf16>
      tpu.vector_store %arg8[%c0_7, %c0_8, %c0_9], %20 {strides = array<i32>} : memref<1x16x128xbf16, #tpu.memory_space<vmem>>, vector<1x16x128xbf16>,
    } else {
    }
    return
  }
  func.func @transform_0(%arg0: i32, %arg1: i32, %arg2: i32, %arg3: memref<4xi32, #tpu.memory_space<smem>>) -> (i32, i32, i32) {
    %c0_i32 = arith.constant 0 : i32
    %c0_i32_0 = arith.constant 0 : i32
    return %arg0, %arg1, %c0_i32 : i32, i32, i32
  }
  func.func @transform_1(%arg0: i32, %arg1: i32, %arg2: i32, %arg3: memref<4xi32, #tpu.memory_space<smem>>) -> (i32, i32, i32) {
    %c0_i32 = arith.constant 0 : i32
    %c0_i32_0 = arith.constant 0 : i32
    return %arg0, %c0_i32, %arg2 : i32, i32, i32
  }
  func.func @transform_2(%arg0: i32, %arg1: i32, %arg2: i32, %arg3: memref<4xi32, #tpu.memory_space<smem>>) -> (i32, i32, i32) {
    %c0_i32 = arith.constant 0 : i32
    %c0_i32_0 = arith.constant 0 : i32
    return %arg0, %arg2, %c0_i32 : i32, i32, i32
  }
  func.func @transform_3(%arg0: i32, %arg1: i32, %arg2: i32, %arg3: memref<4xi32, #tpu.memory_space<smem>>) -> (i32, i32, i32) {
    %c0_i32 = arith.constant 0 : i32
    %c0_i32_0 = arith.constant 0 : i32
    return %arg0, %arg1, %c0_i32 : i32, i32, i32
  }
  func.func @transform_4(%arg0: i32, %arg1: i32, %arg2: i32, %arg3: memref<4xi32, #tpu.memory_space<smem>>) -> (i32, i32, i32) {
    %c0_i32 = arith.constant 0 : i32
    %c0_i32_0 = arith.constant 0 : i32
    return %arg0, %arg1, %c0_i32 : i32, i32, i32
  }
}

</mosaic_0001>

<bundles_post_ra>
// kernel: tpu_custom_call.1
= control target key start
LH: loop header
LB: loop body
LE: loop exit
PB: predicated region body
PF: predicated region fallthrough
CT: control target
= control target key end

     0   :  { %s1647_s0 = inlined_call_operand.vmem [shape: s32[4], index: 0, kind: input, shape index: {}]   ;;  %s1648_s1 = inlined_call_operand.vmem [shape: bf16[4,32,128], index: 1, kind: input, shape index: {}]   ;;  %s1649_s2 = inlined_call_operand.hbm [shape: bf16[4,128,256], index: 2, kind: input, shape index: {}]   ;;  %s1650_s3 = inlined_call_operand.hbm [shape: bf16[4,256,128], index: 3, kind: input, shape index: {}]   ;;  %s1651_s4 = inlined_call_operand.vmem [shape: f32[4,32,1], index: 4, kind: input, shape index: {}]   ;;  %s1652_s5 = inlined_call_operand.hbm [shape: bf16[4,32,128], index: 5, kind: output, shape index: {}]  }
   0x1   :  { %1665 = sst [smem:[#allocation27_spill]] %s1649_s2  ;;  %s10_s20 = sshll.u32 %s1647_s0, 4  ;;  %s11_s20 = int_to_ptr.vmem [resolvable:$true] %s10_s20 }
   0x2   :  { %1666 = sst [smem:[#allocation28_spill]] %s1652_s5  ;;  %s1074_s21 = scalar_lea.vmem %s11_s20, 16 }
   0x3   :  { %p1075_p0 = scmp.ne.s32.totalorder %s11_s20, %s1074_s21  ;;  %p1079_p1 = scmp.lt.s32.totalorder %s11_s20, %s11_s20 }
   0x4   :  { %p1080_p2 = scmp.lt.s32.totalorder %s1074_s21, %s1074_s21 }
   0x6   :  { %p1081_p3 = por %p1080_p2, %p1079_p1 }
   0x8   :  { %p1082_p4 = pnand %p1081_p3, %p1075_p0 }
   0xa   :  { %1085 = shalt.err (!%p1082_p4)  }
   0xb   :  { %s1286_s22 = smov [#allocation4]  }
   0xc   :  { %13 = dma.vmem_to_smem %s11_s20, 16, %s1286_s22, [#allocation3] }
   0xd   :  { %1220 = dma.done.wait [#allocation3], 16 }
   0xe   :  { %1221 = vsyncadd [#allocation3], 4294967280 }
   0xf   :  { %15 = sfence }
  0x10   :  { %16 = vsyncpa [#allocation6], 0 }
  0x11   :  { %18 = vsyncpa [#allocation6 + $0x1], 0 }
  0x12   :  { %19 = vsyncpa [#allocation9], 0 }
  0x13   :  { %21 = vsyncpa [#allocation9 + $0x1], 0 }
  0x14   :  { %22 = vsyncpa [#allocation7], 0 }
  0x15   :  { %24 = vsyncpa [#allocation7 + $0x1], 0  ;;  %s1332_s0 = smov 0   ;;  %s1334_s23 = smov 0  }
  0x16   :  { %s1336_s24 = smov 0   ;;  %s1338_s25 = smov 0  }
  0x17   :  { %s1340_s26 = smov 0   ;;  %s1342_s27 = smov 0  }
  0x18   :  { %s1344_s28 = smov 0   ;;  %s1346_s29 = smov 0  }
  0x19   :  { %s1348_s30 = smov 0   ;;  %s1350_s6 = smov 0  }
  0x1a   :  { %s1352_s7 = smov 0   ;;  %s1354_s8 = smov 0  }
  0x1b   :  { %s1356_s9 = smov 0  }
  0x1c LB: > { %1667 = sst [smem:[#allocation15_spill]] %s1236_s0  ;;  %s808_s10 = sadd.s32 4294967295, %s1284_s9   ;;  %s1284_s9 = sphi %s1356_s9, %s30_s9   ;;  %s1280_s8 = sphi %s1354_s8, %s1710_s8   ;;  %s1276_s7 = sphi %s1352_s7, %s1700_s7   ;;  %s1272_s6 = sphi %s1350_s6, %s1709_s6   ;;  %s1268_s30 = sphi %s1348_s30, %s1708_s30   ;;  %s1264_s29 = sphi %s1346_s29, %s1698_s29   ;;  %s1260_s28 = sphi %s1344_s28, %s1707_s28   ;;  %s1256_s27 = sphi %s1342_s27, %s1697_s27   ;;  %s1252_s26 = sphi %s1340_s26, %s1706_s26   ;;  %s1248_s25 = sphi %s1338_s25, %s1705_s25   ;;  %s1244_s24 = sphi %s1336_s24, %s1704_s24   ;;  %s1240_s23 = sphi %s1334_s23, %s1703_s23   ;;  %s1236_s0 = sphi %s1332_s0, %s1702_s0  }
  0x1d   : > { %1668 = sst [smem:[#allocation16_spill]] %s1244_s24  ;;  %s809_s11 = sadd.s32 4294967294, %s1284_s9  }
  0x1e   : > { %1669 = sst [smem:[#allocation17_spill]] %s1256_s27  ;;  %s42_s12 = sadd.s32 1, %s1272_s6 }
  0x1f   : > { %1670 = sst [smem:[#allocation18_spill]] %s1260_s28  ;;  %s45_s13 = sadd.s32 1, %s1276_s7 }
  0x20   : > { %1671 = sst [smem:[#allocation19_spill]] %s1276_s7  ;;  %p43_p5 = scmp.ge.s32.totalorder %s42_s12, 2 }
  0x21   : > { %s49_s14 = sadd.s32 1, %s1280_s8  ;;  %s86_s15 = sadd.s32 1, %s1256_s27 }
  0x22   : > { %p93_p6 = scmp.ne.s32.totalorder %s1256_s27, %s1252_s26  ;;  %s1712_s12 = smov (%p43_p5, %s42_s12), 0 }
  0x23   : > { %1672 = sst [smem:[#allocation20_spill]] %s1712_s12  ;;  %s1714_s13 = smov (!%p43_p5, %s45_s13), %s1276_s7 }
  0x24   : > { %s82_s16 = ssub.s32 %s1272_s6, %s1712_s12  ;;  %p94_p7 = scmp.eq.s32.totalorder %s1284_s9, 0 }
  0x25   : > { %p47_p8 = scmp.ge.s32.totalorder %s1714_s13, 2  ;;  %p99_p9 = scmp.ne.s32.totalorder %s1252_s26, %s1248_s25 }
  0x26   : > { %p1410_p10 = por %p94_p7, %p93_p6  ;;  %p100_p11 = scmp.eq.s32.totalorder %s808_s10, 0 }
  0x27   : > { %s1716_s13 = smov (%p47_p8, %s1714_s13), 0  ;;  %s1718_s14 = smov (!%p47_p8, %s49_s14), %s1280_s8 }
  0x28   : > { %1674 = sst [smem:[#allocation21_spill]] %s1716_s13  ;;  %p1417_p12 = por %p100_p11, %p99_p9 }
  0x29   : > { %s166_s19 = ssub.s32 %s1276_s7, %s1716_s13  ;;  %p51_p13 = scmp.ge.s32.totalorder %s1718_s14, 4 }
  0x2a   : > { %s170_s20 = sadd.s32 1, %s1244_s24  ;;  %p180_p0 = scmp.ne.s32.totalorder %s1244_s24, %s1240_s23 }
  0x2b   : > { %p181_p1 = scmp.eq.s32.totalorder %s808_s10, 15  ;;  %s1720_s14 = smov (%p51_p13, %s1718_s14), 0 }
  0x2c   : > { %1676 = sst [smem:[#allocation22_spill]] %s1720_s14  ;;  %p186_p3 = scmp.ne.s32.totalorder %s1240_s23, %s1236_s0 }
  0x2d   : > { %p1428_p2 = por %p181_p1, %p180_p0  ;;  %s81_s22 = ssub.s32 %s1280_s8, %s1720_s14 }
  0x2e   : > { %p187_p4 = scmp.eq.s32.totalorder %s809_s11, 15  ;;  %s83_s25 = sor.u32 %s82_s16, %s81_s22 }
  0x2f   : > { %s1677_s21 = scalar_select %p1428_p2, 1, 0 }
  0x30   : > { %s167_s13 = sor.u32 %s166_s19, %s81_s22  ;;  %p84_p5 = scmp.eq.s32.totalorder %s83_s25, 0 }
  0x31   : > { %1678 = sst [smem:[#allocation23_spill]] %s1677_s21  ;;  %p168_p6 = scmp.eq.s32.totalorder %s167_s13, 0 }
  0x32   : > { %p1436_p7 = por %p187_p4, %p186_p3  ;;  %p940_p8 = scmp.lt.s32.totalorder %s1284_s9, 16 }
  0x33   : > { %s1441_s12 = scalar_select %p84_p5, %s1256_s27, %s86_s15  }
  0x34   : > { %s1679_s10 = scalar_select %p1436_p7, 1, 0 }
  0x35   : > { %1681 = sst [smem:[#allocation25_spill]] %s1441_s12  ;;  %s1448_s5 = sand.u32 1, %s1256_s27  }
  0x36   : > { %1680 = sst [smem:[#allocation24_spill]] %s1679_s10  ;;  %s812_s11 = sshll.u32 %s1448_s5, 6 }
  0x37   : > { %s1444_s7 = scalar_select %p168_p6, %s1244_s24, %s170_s20  }
  0x38   : > { %s1659_s16 = sshll.u32 %s1280_s8, 5  ;;  %s224_s13 = scalar_lea.vmem [#allocation5], %s812_s11 }
  0x39   : > { %1682 = sst [smem:[#allocation26_spill]] %s1444_s7  ;;  %s229_s19 = sadd.s32 %s1272_s6, %s1659_s16 }
  0x3a   : > { %s232_s22 = sshll.u32 %s224_s13, 4  ;;  %s814_s25 = sshll.u32 %s229_s19, 6  ;;  %s233_s22 = int_to_ptr.vmem [resolvable:$true] %s232_s22 }
  0x3b   : > { %s1683_s2 = sld [smem:[#allocation27_spill]]  ;;  %p1462_p9 = pnand %p940_p8, %p1410_p10 }
  0x3c   : > { %s221_s27 = scalar_lea.sflag [#allocation6], %s1448_s5  ;;  %s1099_s16 = scalar_lea.vmem %s233_s22, 1024 }
  0x3d   : > { %p1088_p11 = pneg %p1462_p9  ;;  %p1100_p13 = scmp.ne.s32.totalorder %s233_s22, %s1099_s16 }
  0x3e   : > { %s1287_s19 = smov [#allocation5]  }
  0x3f   : > { %p1102_p0 = pnand %p1100_p13, %p1088_p11  ;;  %s1104_s13 = sshll.u32 %s1287_s19, 4  ;;  %s1105_s13 = int_to_ptr.vmem [resolvable:$false] %s1104_s13 }
  0x40   : > { %s1106_s14 = scalar_lea.vmem %s1105_s13, 2048  ;;  %p1107_p3 = scmp.lt.s32.totalorder %s233_s22, %s1105_s13 }
  0x41   : > { %s231_s20 = scalar_lea.hbm %s1683_s2, %s814_s25  ;;  %p1103_p1 = pneg %p1102_p0 }
  0x42   : > { %p1108_p10 = scmp.lt.s32.totalorder %s1106_s14, %s1099_s16 }
  0x44   : > { %p1109_p4 = por %p1108_p10, %p1107_p3 }
  0x46   : > { %p1110_p5 = pnand %p1109_p4, %p1103_p1 }
  0x48   : > { %1113 = shalt.err (!%p1110_p5)
}
  0x49   : > { %s1288_s17 = smov 128   ;;  %s1289_s25 = smov 64  }
  0x4a   : > { %s1290_s15 = smov 4   ;;  %p819_p6 = scmp.ge.s32.totalorder %s1284_s9, 1 }
  0x4b   : > { %932 = dma.hbm_to_vmem [thread:$0]  (!%p1462_p9), %s231_s20, 1024, %s233_s22, %s221_s27, %s1288_s17, %s1289_s25, %s1290_s15  }
  0x4c   : > { %p276_p8 = scmp.lt.s32.totalorder %s1284_s9, 17  ;;  %s816_s19 = sshll.u32 %s1272_s6, 4 }
  0x4d   : > { %s1686_s13 = sshll.u32 %s1280_s8, 5  ;;  %s246_s2 = scalar_lea.vmem [#allocation8], %s812_s11 }
  0x4e   : > { %p1478_p13 = pnand %p819_p6, %p276_p8  ;;  %s252_s14 = sadd.s32 %s816_s19, %s1686_s13 }
  0x4f   : > { %s255_s7 = sshll.u32 %s246_s2, 4  ;;  %s818_s24 = sshll.u32 %s252_s14, 6  ;;  %s256_s7 = int_to_ptr.vmem [resolvable:$true] %s255_s7 }
  0x50   : > { %s254_s21 = scalar_lea.hbm %s1650_s3, %s818_s24  ;;  %s243_s28 = scalar_lea.sflag [#allocation9], %s1448_s5 }
  0x51   : > { %s1127_s27 = scalar_lea.vmem %s256_s7, 1024  ;;  %s1291_s22 = smov [#allocation8]  }
  0x52   : > { %p1128_p0 = scmp.ne.s32.totalorder %s256_s7, %s1127_s27  ;;  %s1132_s20 = sshll.u32 %s1291_s22, 4  ;;  %s1133_s20 = int_to_ptr.vmem [resolvable:$false] %s1132_s20 }
  0x53   : > { %s1134_s17 = scalar_lea.vmem %s1133_s20, 2048  ;;  %p1135_p10 = scmp.lt.s32.totalorder %s256_s7, %s1133_s20 }
  0x54   : > { %p1130_p1 = pnand %p1128_p0, %p1088_p11  ;;  %p1136_p4 = scmp.lt.s32.totalorder %s1134_s17, %s1127_s27 }
  0x56   : > { %p1131_p3 = pneg %p1130_p1  ;;  %p1137_p5 = por %p1136_p4, %p1135_p10 }
  0x58   : > { %p1138_p6 = pnand %p1137_p5, %p1131_p3 }
  0x5a   : > { %1141 = shalt.err (!%p1138_p6)
}
  0x5b   : > { %935 = dma.hbm_to_vmem [thread:$0]  (!%p1462_p9), %s254_s21, 1024, %s256_s7, %s243_s28, %s1289_s25, %s1289_s25, %s1290_s15  }
  0x5c   : > { %280 = sbr.rel (%p1478_p13) target bundleno = 740 (0x2e4), region = 36  ;;  %s282_s2 = sand.u32 (!%p1478_p13), 1, %s1252_s26  }
  0x5d   : > { %s820_s5 = sshll.u32 (!%p1478_p13), %s282_s2, 6  ;;  %s283_s0 = scalar_lea.sflag (!%p1478_p13), [#allocation6], %s282_s2 }
  0x5e   : > { %s1502_s24 = scalar_lea.vmem (!%p1478_p13), [#allocation5], %s820_s5 }
  0x61   : > { %1223 = dma.done.wait (%p1417_p12), %s283_s0, 1024  }
  0x62   : > { %1225 = vsyncadd (%p1417_p12), %s283_s0, 4294966272  ;;  %s292_s12 = scalar_lea.sflag [#allocation9], %s282_s2  ;;  %s1508_s10 = scalar_lea.vmem [#allocation8], %s820_s5 }
  0x63   : > { %1227 = dma.done.wait (%p1417_p12), %s292_s12, 1024  }
  0x64   : > { %1229 = vsyncadd (%p1417_p12), %s292_s12, 4294966272  ;;  %s340_s28 = sand.u32 1, %s1240_s23   ;;  %s1516_s7 = sshll.u32 %s1264_s29, 1 }
  0x65   : > { %s1520_s21 = sshll.u32 %s340_s28, 3  ;;  %p344_p9 = scmp.lt.s32.totalorder %s1268_s30, 3 }
  0x66   : > { %p346_p11 = scmp.lt.s32.totalorder %s1516_s7, 3  ;;  %s342_s2 = scalar_lea.vmem [#allocation10], %s1520_s21 }
  0x67   : > { %s345_s11 = scalar_select %p344_p9, %s1268_s30, 3 }
  0x68   : > { %s347_s25 = scalar_select %p346_p11, %s1516_s7, 3 }
  0x69   : > { %s824_s18 = sshll.u32 %s345_s11, 2  ;;  %s1687_s5 = sld [smem:[#allocation18_spill]] }
  0x6a   : > { %s349_s15 = sadd.s32 %s824_s18, %s347_s25 }
  0x6b   : > { %s825_s16 = sshll.u32 %s349_s15, 2  ;;  %s828_s19 = sshll.u32 %s349_s15, 3 }
  0x6c   : > { %s1529_s27 = scalar_lea.vmem %s1648_s1, %s825_s16  ;;  %s1534_s17 = scalar_lea.vmem %s1651_s4, %s828_s19 }
  0x6f   : > { %p829_p12 = scmp.ne.s32.totalorder %s1687_s5, 0 }
  0x71   : > { %369 = sbr.rel (%p829_p12) target bundleno = 120 (0x78), region = 48 }
  0x76   : > { %v1292_v0 = vmov 0.0  }
  0x77   : > { %370 = vst [vmem:[#allocation2] sm:$0xff] %v1292_v0  ;;  %371 = vst [vmem:[#allocation2 + $0x8] sm:$0xff] %v1292_v0 }
  0x78 PF: > { %s830_s0 = sshll.u32 %s1264_s29, 4  ;;  %s373_s12 = sld [smem:[#allocation4 + %s1268_s30]] }
  0x7e   : > { %p831_p8 = scmp.ge.s32.totalorder %s830_s0, %s373_s12 }
  0x80   : > { %377 = sbr.rel (%p831_p8) target bundleno = 567 (0x237), region = 52 }
  0x85   : > { %v1056_v1 = vld [vmem:[%s1502_s24 + $0x38] sm:$0xff]   ;;  %v1293_v2 = vmov 0.0   ;;  %v1057_v3 = vld [vmem:[%s1502_s24 + $0x30] sm:$0xff]   ;;  %vm1294_vm0 = vmmov 0   ;;  %v1058_v4 = vld [vmem:[%s1502_s24 + $0x28] sm:$0xff]  }
  0x86   : > { %883 = vmatprep.subr.bf16.mxu0 %v1293_v2  ;;  %903 = vmatprep.subr.bf16.mxu1 %v1293_v2  ;;  %v1065_v5 = vld [vmem:[%s1508_s10 + $0x38] sm:$0xff]   ;;  %v1059_v6 = vld [vmem:[%s1502_s24 + $0x20] sm:$0xff]   ;;  %v1066_v7 = vld [vmem:[%s1508_s10 + $0x30] sm:$0xff]  }
  0x87   : > { %884 = vmatpush3.bf16.msra.mxu0 %v1056_v1  ;;  %899 = vmatprep.mubr.msk.bf16.mxu0 %vm1294_vm0, %v1293_v2  ;;  %v1060_v8 = vld [vmem:[%s1502_s24 + $0x18] sm:$0xff]   ;;  %v1067_v9 = vld [vmem:[%s1508_s10 + $0x28] sm:$0xff]   ;;  %v1061_v10 = vld [vmem:[%s1502_s24 + $0x10] sm:$0xff]  }
  0x88   : > { %885 = vmatprep.subr.bf16.mxu0 %v1293_v2  ;;  %919 = vmatprep.mubr.msk.bf16.mxu1 %vm1294_vm0, %v1293_v2  ;;  %v1068_v11 = vld [vmem:[%s1508_s10 + $0x20] sm:$0xff]   ;;  %v1062_v12 = vld [vmem:[%s1502_s24 + $0x8] sm:$0xff]   ;;  %v1069_v13 = vld [vmem:[%s1508_s10 + $0x18] sm:$0xff]  }
  0x89   : > { %904 = vmatpush3.bf16.msra.mxu1 %v1065_v5  ;;  %v1063_v14 = vld [vmem:[%s1502_s24] sm:$0xff]   ;;  %v1070_v15 = vld [vmem:[%s1508_s10 + $0x10] sm:$0xff]   ;;  %v1071_v17 = vld [vmem:[%s1508_s10 + $0x8] sm:$0xff]  }
  0x8a   : > { %905 = vmatprep.subr.bf16.mxu1 %v1293_v2  ;;  %v1064_v16 = vld [vmem:[%s1529_s27] sm:$0xff]   ;;  %v1072_v18 = vld [vmem:[%s1508_s10] sm:$0xff]   ;;  %v495_v30 = vld [vmem:[#allocation2 + $0x8] sm:$0xff] }
  0x8b   : > { %886 = vmatpush3.bf16.msra.mxu0 %v1057_v3  ;;  %v494_v26 = vld [vmem:[#allocation2] sm:$0xff] }
  0x8c   : > { %887 = vmatprep.subr.bf16.mxu0 %v1293_v2 }
  0x8d   : > { %906 = vmatpush3.bf16.msra.mxu1 %v1066_v7 }
  0x8e   : > { %907 = vmatprep.subr.bf16.mxu1 %v1293_v2 }
  0x8f   : > { %888 = vmatpush3.bf16.msra.mxu0 %v1058_v4 }
  0x90   : > { %889 = vmatprep.subr.bf16.mxu0 %v1293_v2 }
  0x91   : > { %908 = vmatpush3.bf16.msra.mxu1 %v1067_v9 }
  0x92   : > { %909 = vmatprep.subr.bf16.mxu1 %v1293_v2 }
  0x93   : > { %890 = vmatpush3.bf16.msra.mxu0 %v1059_v6 }
  0x94   : > { %891 = vmatprep.subr.bf16.mxu0 %v1293_v2 }
  0x95   : > { %910 = vmatpush3.bf16.msra.mxu1 %v1068_v11 }
  0x96   : > { %911 = vmatprep.subr.bf16.mxu1 %v1293_v2 }
  0x97   : > { %892 = vmatpush3.bf16.msra.mxu0 %v1060_v8 }
  0x98   : > { %893 = vmatprep.subr.bf16.mxu0 %v1293_v2 }
  0x99   : > { %912 = vmatpush3.bf16.msra.mxu1 %v1069_v13 }
  0x9a   : > { %913 = vmatprep.subr.bf16.mxu1 %v1293_v2 }
  0x9b   : > { %894 = vmatpush3.bf16.msra.mxu0 %v1061_v10 }
  0x9c   : > { %895 = vmatprep.subr.bf16.mxu0 %v1293_v2 }
  0x9d   : > { %914 = vmatpush3.bf16.msra.mxu1 %v1070_v15 }
  0x9e   : > { %915 = vmatprep.subr.bf16.mxu1 %v1293_v2 }
  0x9f   : > { %896 = vmatpush3.bf16.msra.mxu0 %v1062_v12 }
  0xa0   : > { %897 = vmatprep.subr.bf16.mxu0 %v1293_v2 }
  0xa1   : > { %916 = vmatpush3.bf16.msra.mxu1 %v1071_v17 }
  0xa2   : > { %917 = vmatprep.subr.bf16.mxu1 %v1293_v2 }
  0xa3   : > { %898 = vmatpush3.bf16.msra.mxu0 %v1063_v14 }
  0xa5   : > { %918 = vmatpush3.bf16.msra.mxu1 %v1072_v18 }
  0xa6   : > { %900 = vmatmul.mubr.bf16.vlgmr.msra.gmra.mxu0 %v1064_v16 }
 0x166   : > { %v484_v19 = vpop.f32.mrf.mxu0 }
 0x167   : > { %v491_v22 = vmax.f32 %v484_v19, 0.0 }
 0x168   : > { %v901_v20 = vpop.f32.mrf.mxu0 }
 0x16a   : > { %v487_v21 = vpop.f32.mrf.mxu0 }
 0x16b   : > { %v492_v23 = vmax.f32 %v487_v21, 0.0 }
 0x16c   : > { %v902_v24 = vpop.f32.mrf.mxu0 }
 0x16d   : > { %v493_v25 = vpack.c.bf16 %v492_v23, %v491_v22 }
 0x16f   : > { %920 = vmatmul.mubr.bf16.vlgmr.msra.gmra.mxu1 %v493_v25 }
 0x22f   : > { %v594_v27 = vpop.f32.mrf.mxu1 }
 0x230   : > { %v601_v28 = vadd.f32 %v594_v27, %v494_v26 }
 0x231   : > { %v921_v29 = vpop.f32.mrf.mxu1 }
 0x232   : > { %603 = vst [vmem:[#allocation2] sm:$0xff] %v601_v28 }
 0x233   : > { %v597_v31 = vpop.f32.mrf.mxu1 }
 0x234   : > { %v602_v32 = vadd.f32 %v597_v31, %v495_v30 }
 0x235   : > { %v922_v33 = vpop.f32.mrf.mxu1 }
 0x236   : > { %604 = vst [vmem:[#allocation2 + $0x8] sm:$0xff] %v602_v32 }
 0x237 PF: > { %s1688_s29 = sld [smem:[#allocation18_spill]] }
 0x23d   : > { %p849_p13 = scmp.ne.s32.totalorder %s1688_s29, 1 }
 0x23f   : > { %608 = sbr.rel (%p849_p13) target bundleno = 715 (0x2cb), region = 56 }
 0x244   : > { %v611_v34 = vld [vmem:[%s1534_s17] sm:$0xff]  ;;  %v1295_v35 = vmov 0   ;;  %v612_v36 = vld [vmem:[%s1534_s17 + $0x8] sm:$0xff] }
 0x245   : > { %1073 = vset.pattern.permute.xlu0 %v1295_v35  ;;  %v609_v38 = vld [vmem:[#allocation2] sm:$0xff]  ;;  %v610_v39 = vld [vmem:[#allocation2 + $0x8] sm:$0xff] }
 0x246   : > { %615 = vperm.xlu0 %1073, %v611_v34  }
 0x24a   : > { %620 = vperm.xlu0 %1073, %v612_v36  }
 0x2c1   : > { %v616_v37 = vpop.permute.xlu0 %615 }
 0x2c2   : > { %v623_v41 = vmul.f32 %v616_v37, %v609_v38 }
 0x2c5   : > { %v621_v40 = vpop.permute.xlu0 %620 }
 0x2c6   : > { %v624_v42 = vmul.f32 %v621_v40, %v610_v39 }
 0x2c8   : > { %v863_v43 = vpack.c.bf16 %v624_v42, %v623_v41 }
 0x2ca   : > { %864 = vst [vmem:[%s342_s2] sm:$0xff] %v863_v43  }
 0x2cb PF: > { %s854_s10 = sshll.u32 %s1268_s30, 2  ;;  %s651_s25 = sshll.u32 %s342_s2, 4  ;;  %s1566_s25 = int_to_ptr.vmem [resolvable:$true] %s651_s25 }
 0x2cc   : > { %s648_s11 = sadd.s32 %s854_s10, %s1516_s7  ;;  %s1690_s19 = sld [smem:[#allocation28_spill]] }
 0x2cd   : > { %s855_s18 = sshll.u32 %s648_s11, 6  ;;  %s1575_s14 = scalar_lea.sflag [#allocation7], %s340_s28 }
 0x2ce   : > { %s1142_s27 = scalar_lea.vmem %s1566_s25, 128  ;;  %s1296_s30 = smov [#allocation10]  }
 0x2cf   : > { %p1143_p0 = scmp.ne.s32.totalorder %s1566_s25, %s1142_s27  ;;  %s1146_s7 = sshll.u32 %s1296_s30, 4  ;;  %s1147_s7 = int_to_ptr.vmem [resolvable:$false] %s1146_s7 }
 0x2d0   : > { %s1148_s21 = scalar_lea.vmem %s1147_s7, 256  ;;  %p1149_p10 = scmp.lt.s32.totalorder %s1566_s25, %s1147_s7 }
 0x2d1   : > { %p1144_p1 = pnand %p1143_p0, %p1428_p2  ;;  %p1150_p4 = scmp.lt.s32.totalorder %s1148_s21, %s1142_s27 }
 0x2d2   : > { %s1571_s13 = scalar_lea.hbm %s1690_s19, %s855_s18 }
 0x2d3   : > { %p1145_p3 = pneg %p1144_p1  ;;  %p1151_p5 = por %p1150_p4, %p1149_p10 }
 0x2d5   : > { %p1152_p6 = pnand %p1151_p5, %p1145_p3 }
 0x2d7   : > { %1155 = shalt.err (!%p1152_p6)
}
 0x2d8   : > { %s1156_s28 = scalar_lea.hbm %s1571_s13, 128  ;;  %s1160_s17 = scalar_lea.hbm %s1690_s19, 1024 }
 0x2d9   : > { %p1157_p9 = scmp.ne.s32.totalorder %s1571_s13, %s1156_s28  ;;  %p1161_p8 = scmp.lt.s32.totalorder %s1571_s13, %s1690_s19 }
 0x2da   : > { %p1162_p13 = scmp.lt.s32.totalorder %s1160_s17, %s1156_s28 }
 0x2db   : > { %p1158_p11 = pnand %p1157_p9, %p1428_p2 }
 0x2dc   : > { %p1163_p0 = por %p1162_p13, %p1161_p8 }
 0x2dd   : > { %p1159_p12 = pneg %p1158_p11 }
 0x2df   : > { %p1164_p1 = pnand %p1163_p0, %p1159_p12 }
 0x2e1   : > { %1167 = shalt.err (!%p1164_p1)
}
 0x2e2   : > { %s1297_s0 = smov 64   ;;  %s1298_s12 = smov 4  }
 0x2e3   : > { %927 = dma.vmem_to_hbm [thread:$0]  (%p1428_p2), %s1566_s25, 128, %s1571_s13, %s1575_s14, %s1297_s0, %s1297_s0, %s1298_s12  }
 0x2e4 PF: > { %s1691_s29 = sld [smem:[#allocation15_spill]]  ;;  %p941_p3 = scmp.ge.s32.totalorder %s1284_s9, 2 }
 0x2e6   : > { %p937_p10 = pnand %p941_p3, %p1436_p7 }
 0x2e8   : > { %p938_p4 = pneg %p937_p10 }
 0x2ea   : > { %s666_s11 = sand.u32 1, %s1691_s29  }
 0x2eb   : > { %s667_s18 = scalar_lea.sflag [#allocation7], %s666_s11 }
 0x2ec   : > { %1231 = dma.done.wait (%p938_p4), %s667_s18, 128  }
 0x2ed   : > { %1233 = vsyncadd (%p938_p4), %s667_s18, 4294967168  ;;  %s30_s9 = sadd.s32 1, %s1284_s9   ;;  %s1694_s24 = sld [smem:[#allocation16_spill]] }
 0x2ee   : > { %p1603_p5 = scmp.ge.s32.totalorder %s30_s9, 18   ;;  %s1695_s25 = sld [smem:[#allocation26_spill]] }
 0x2ef   : > { %s1696_s16 = sld [smem:[#allocation17_spill]]  ;;  %s1702_s0 = smov %s1240_s23 }
 0x2f0   : > { %s1697_s27 = sld [smem:[#allocation25_spill]]  ;;  %s1707_s28 = smov %s1272_s6 }
 0x2f1   : > { %s1698_s29 = sld [smem:[#allocation19_spill]]  ;;  %s1708_s30 = smov %s1280_s8 }
 0x2f2   : > { %s1699_s13 = sld [smem:[#allocation20_spill]] }
 0x2f3   : > { %s1700_s7 = sld [smem:[#allocation21_spill]]  ;;  %s1703_s23 = smov %s1694_s24 }
 0x2f4   : > { %s1701_s14 = sld [smem:[#allocation22_spill]]  ;;  %s1704_s24 = smov %s1695_s25 }
 0x2f5   : > { %s1705_s25 = smov %s1252_s26  ;;  %s1706_s26 = smov %s1696_s16 }
 0x2f6   :  { %29 = sbr.rel (!%p1603_p5) target bundleno = 28 (0x1c), region = 112 }
 0x2f8   : > { %s1709_s6 = smov %s1699_s13 }
 0x2fa   : > { %s1710_s8 = smov %s1701_s14 }
 0x2fb   :  { %672 = vsyncpa [#allocation6], 1 }
 0x2fc   :  { %674 = vsyncpa [#allocation6 + $0x1], 1 }
 0x2fd   :  { %675 = vsyncpa [#allocation9], 1 }
 0x2fe   :  { %677 = vsyncpa [#allocation9 + $0x1], 1 }
 0x2ff   :  { %678 = vsyncpa [#allocation7], 1 }
 0x300   :  { %680 = vsyncpa [#allocation7 + $0x1], 1 }

</bundles_post_ra>
